<compile_context>
chip_gen: v7x
topology: tpu7x:2x2x1
jax: 0.10.0
libtpu: 0.0.40
codegen_flags: <defaults>
</compile_context>

<pallas_src>
import functools

import jax
import jax.numpy as jnp
from jax.experimental import pallas as pl
from jax.experimental.pallas import tpu as pltpu

LANE = 128


def _round_up(n, m):
    return ((n + m - 1) // m) * m


def _critic_kernel(mode_is_dre, n_hidden, cast_dtype, *refs):
    """refs = (x_ref, w0, b0, ..., w_{L-1}, b_{L-1}, out_ref).

    Hidden layers run in the natural (TB, feat) orientation with bf16 MXU inputs
    and f32 accumulation / elementwise.  The last layer is computed transposed so
    the output block is (d_out_pad8, TB): batch on lanes, lane-dense store.
    """
    x_ref = refs[0]
    out_ref = refs[-1]
    params = refs[1:-1]

    h = x_ref[...]                                   # (TB, d_in)  cast_dtype
    h32 = h.astype(jnp.float32)                      # f32 view of current activation
    for i in range(n_hidden):
        w = params[2 * i][...]                       # (d_i, d_{i+1}_pad)  cast_dtype
        b = params[2 * i + 1][...]                   # (1, d_{i+1}_pad)    f32
        h32 = jnp.dot(h, w, preferred_element_type=jnp.float32) + b
        h32 = jnp.maximum(h32, 0.0)                  # relu, f32 on the VPU
        h = h32.astype(cast_dtype)                   # bf16 feed for next matmul

    wT = params[-2][...]                             # (d_out_pad8, d_prev) f32
    bT = params[-1][...]                             # (d_out_pad8, 1)      f32
    # out^T = W^T @ h^T  (f32 transpose of the small last-hidden activation; the
    # matmul is tiny so f32 MXU emulation cost is negligible).
    oT = jnp.dot(wT, h32.T, preferred_element_type=jnp.float32) + bT
    if mode_is_dre:
        oT = jax.nn.sigmoid(oT)                      # EUP exp/recip, f32
    out_ref[...] = oT.astype(out_ref.dtype)          # (d_out_pad8, TB) lane-dense


def _pad_params(weights, biases, compute_dtype):
    """Zero-pad hidden widths to multiples of 128 lanes; store the final layer
    transposed with its output dim padded to a multiple of 8 sublanes.

    Zero padding is exact: relu(0)=0, padded rows/cols contribute nothing, and the
    padded output rows / batch lanes are sliced off by the wrapper.
    """
    pw, pb = [], []
    prev = weights[0].shape[0]                       # d_in, left unpadded
    for i in range(len(weights) - 1):                # hidden layers
        w = weights[i].astype(jnp.float32)
        b = jnp.reshape(biases[i], (1, -1)).astype(jnp.float32)
        d_i, d_o = w.shape
        d_o_pad = _round_up(d_o, LANE)
        w_p = jnp.zeros((prev, d_o_pad), jnp.float32).at[:d_i, :d_o].set(w)
        b_p = jnp.zeros((1, d_o_pad), jnp.float32).at[:, :d_o].set(b)
        pw.append(w_p.astype(compute_dtype))         # bf16 MXU feed
        pb.append(b_p)                               # bias stays f32
        prev = d_o_pad
    # Final layer, stored transposed and kept in f32 (tiny).
    w = weights[-1].astype(jnp.float32)
    b = jnp.reshape(biases[-1], (1, -1)).astype(jnp.float32)
    d_i, d_o = w.shape
    d_o_pad = _round_up(d_o, 8)
    wT = jnp.zeros((d_o_pad, prev), jnp.float32).at[:d_o, :d_i].set(w.T)
    bT = jnp.zeros((d_o_pad, 1), jnp.float32).at[:d_o, 0].set(b[0])
    pw.append(wT)
    pb.append(bT)
    return pw, pb, d_o_pad


def _choose_tiles(B, batch_tile):
    """Pick a lane-aligned batch tile; prefer an even tile count for v7x megacore."""
    batch_tile = max(LANE, (batch_tile // LANE) * LANE)
    n_tiles = pl.cdiv(B, batch_tile)
    if n_tiles > 1 or B > batch_tile // 2:
        n_tiles = max(2, n_tiles)
        n_tiles = ((n_tiles + 1) // 2) * 2           # even => both v7x TCs busy
    TB = _round_up(pl.cdiv(B, n_tiles), LANE)        # lane-aligned (output lanes)
    return TB, n_tiles


def critic_forward(x, weights, biases, mode="DRE", batch_tile=2048, use_bf16=True):
    """x: (B, dim_in). weights[i]: (d_i, d_{i+1}) (already transposed vs. PyTorch's
    (out, in) Linear layout). biases[i]: (d_{i+1},) or (1, d_{i+1})."""
    n_layers = len(weights)
    assert len(biases) == n_layers
    B, d_in = x.shape
    dim_out = weights[-1].shape[1]
    cdt = jnp.bfloat16 if use_bf16 else jnp.float32

    pw, pb, d_out_pad = _pad_params(weights, biases, cdt)

    TB, n_tiles = _choose_tiles(B, batch_tile)
    B_pad = TB * n_tiles
    x_p = x.astype(cdt)                              # bf16 halves the dominant x stream
    if B_pad != B:
        x_p = jnp.zeros((B_pad, d_in), cdt).at[:B].set(x_p)

    kernel = functools.partial(_critic_kernel, mode == "DRE", n_layers - 1, cdt)

    # x / out tiled over batch; params resident (constant index_map, fetched once).
    in_specs = [pl.BlockSpec((TB, d_in), lambda i: (i, 0))]
    args = [x_p]
    for w, b in zip(pw, pb):
        in_specs.append(pl.BlockSpec(w.shape, lambda i: (0, 0)))
        in_specs.append(pl.BlockSpec(b.shape, lambda i: (0, 0)))
        args.append(w)
        args.append(b)
    out_specs = pl.BlockSpec((d_out_pad, TB), lambda i: (0, i))   # batch on lanes

    # Size the VMEM request from the real footprint; cap at 48 MiB (v7x has 64 MiB).
    param_bytes = sum(int(a.size) * a.dtype.itemsize for a in args[1:])
    widths = [d_in] + [int(w.shape[1]) for w in pw[:-1]]
    act_bytes = 4 * TB * max(widths) * 4                          # f32/bf16 temps
    io_bytes = 2 * TB * d_in * x_p.dtype.itemsize + 2 * d_out_pad * TB * 4
    vmem_limit = int(min(max(2 * param_bytes + io_bytes + act_bytes + (2 << 20),
                             16 << 20), 48 << 20))
    # TODO(synk): for very wide hidden layers (resident params >~24 MiB) add a
    # K/N-tiled weight path with an f32 accumulator (and single-buffer the invariant
    # weight specs) so the kernel still fits v7x's 64 MiB VMEM.

    out = pl.pallas_call(
        kernel,
        out_shape=jax.ShapeDtypeStruct((d_out_pad, B_pad), jnp.float32),
        grid=(n_tiles,),
        in_specs=in_specs,
        out_specs=out_specs,
        compiler_params=pltpu.CompilerParams(
            dimension_semantics=("parallel",),       # megacore on v7x; harmless elsewhere
            vmem_limit_bytes=vmem_limit,
        ),
    )(*args)
    return out[:dim_out, :B].T                       # (B, dim_out); reshape for dim_out=1


def _init_params(key, dims):
    """Deterministic init mimicking nn.Linear shapes; weights returned as (in, out)."""
    weights, biases = [], []
    for i in range(len(dims) - 1):
        key, kw, kb = jax.random.split(key, 3)
        bound = 1.0 / jnp.sqrt(dims[i])
        w = jax.random.uniform(kw, (dims[i], dims[i + 1]), jnp.float32, -bound, bound)
        b = jax.random.uniform(kb, (1, dims[i + 1]), jnp.float32, -bound, bound)
        weights.append(w)
        biases.append(b)
    return weights, biases


def _reference(x, weights, biases, mode="DRE"):
    h = x
    for i, (w, b) in enumerate(zip(weights, biases)):
        h = h @ w + b
        if i < len(weights) - 1:
            h = jnp.maximum(h, 0.0)
    if mode == "DRE":
        h = jax.nn.sigmoid(h)
    return h


if __name__ == "__main__":
    # Critic(dim_in=32, dim_out=1, dim_hid=[64, 32], act='relu', mode='DRE')
    dim_in, dim_hid, dim_out = 32, [64, 32], 1
    batch = 8
    dims = [dim_in] + dim_hid + [dim_out]

    key = jax.random.PRNGKey(0)
    key, kx = jax.random.split(key)
    x = jax.random.normal(kx, (batch, dim_in), jnp.float32)
    weights, biases = _init_params(key, dims)

    ref = _reference(x, weights, biases, mode="DRE")

    # f32 path: exact structure check (tight tolerance).
    out_f32 = jax.block_until_ready(
        critic_forward(x, weights, biases, mode="DRE", use_bf16=False))
    assert out_f32.shape == (batch, dim_out), out_f32.shape
    assert jnp.allclose(out_f32, ref, atol=1e-4, rtol=1e-4), (
        float(jnp.max(jnp.abs(out_f32 - ref))))

    # bf16 MXU path (default): looser tolerance vs. the f32 reference.
    out_bf16 = jax.block_until_ready(
        critic_forward(x, weights, biases, mode="DRE", use_bf16=True))
    assert jnp.allclose(out_bf16, ref, atol=2e-2, rtol=2e-2), (
        float(jnp.max(jnp.abs(out_bf16 - ref))))

    # Non-DRE mode (no sigmoid), f32.
    ref_lin = _reference(x, weights, biases, mode="WGP")
    out_lin = jax.block_until_ready(
        critic_forward(x, weights, biases, mode="WGP", use_bf16=False))
    assert jnp.allclose(out_lin, ref_lin, atol=1e-4, rtol=1e-4), (
        float(jnp.max(jnp.abs(out_lin - ref_lin))))

    # Multi-tile, non-tile-multiple batch (grid == 2, padded tail, both TCs on v7x).
    key, kx2 = jax.random.split(key)
    x_big = jax.random.normal(kx2, (1037, dim_in), jnp.float32)
    ref_big = _reference(x_big, weights, biases, mode="DRE")
    out_big_f32 = jax.block_until_ready(
        critic_forward(x_big, weights, biases, mode="DRE", use_bf16=False))
    assert out_big_f32.shape == (1037, dim_out)
    assert jnp.allclose(out_big_f32, ref_big, atol=1e-4, rtol=1e-4), (
        float(jnp.max(jnp.abs(out_big_f32 - ref_big))))
    out_big_bf16 = jax.block_until_ready(
        critic_forward(x_big, weights, biases, mode="DRE", use_bf16=True))
    assert jnp.allclose(out_big_bf16, ref_big, atol=2e-2, rtol=2e-2), (
        float(jnp.max(jnp.abs(out_big_bf16 - ref_big))))

    # TODO(synk): training_loss / CriticLoss (DRE/WGP loss functions, gradient-penalty
    # interpolation) are host-level training code, not part of forward; not kernelized.
    print("KERNEL_OK")
</pallas_src>

<mosaic_0001>
module attributes {stable_mosaic.version = 11 : i64} {
  func.func @_critic_kernel(%arg0: i32, %arg1: memref<128x32xf32, #tpu.memory_space<vmem>>, %arg2: memref<32x128xf32, #tpu.memory_space<vmem>>, %arg3: memref<1x128xf32, #tpu.memory_space<vmem>>, %arg4: memref<128x128xf32, #tpu.memory_space<vmem>>, %arg5: memref<1x128xf32, #tpu.memory_space<vmem>>, %arg6: memref<8x128xf32, #tpu.memory_space<vmem>>, %arg7: memref<8x1xf32, #tpu.memory_space<vmem>>, %arg8: memref<8x128xf32, #tpu.memory_space<vmem>>) attributes {dimension_semantics = [#tpu.dimension_semantics<parallel>], iteration_bounds = array<i64: 1>, scalar_prefetch = 0 : i64, scratch_operands = 0 : i64, tpu.core_type = #tpu.core_type<tc>, window_params = [{transform_indices = @transform_0, window_bounds = array<i64: 128, 32>}, {pipeline_mode = #tpu.pipeline_mode<synchronous>, transform_indices = @transform_1, window_bounds = array<i64: 32, 128>}, {pipeline_mode = #tpu.pipeline_mode<synchronous>, transform_indices = @transform_2, window_bounds = array<i64: 1, 128>}, {pipeline_mode = #tpu.pipeline_mode<synchronous>, transform_indices = @transform_3, window_bounds = array<i64: 128, 128>}, {pipeline_mode = #tpu.pipeline_mode<synchronous>, transform_indices = @transform_4, window_bounds = array<i64: 1, 128>}, {pipeline_mode = #tpu.pipeline_mode<synchronous>, transform_indices = @transform_5, window_bounds = array<i64: 8, 128>}, {pipeline_mode = #tpu.pipeline_mode<synchronous>, transform_indices = @transform_6, window_bounds = array<i64: 8, 1>}, {transform_indices = @transform_7, window_bounds = array<i64: 8, 128>}]} {
    %c0 = arith.constant 0 : index
    %c0_0 = arith.constant 0 : index
    %0 = vector.load %arg1[%c0, %c0_0] : memref<128x32xf32, #tpu.memory_space<vmem>>, vector<128x32xf32>
    %c0_1 = arith.constant 0 : index
    %c0_2 = arith.constant 0 : index
    %1 = vector.load %arg2[%c0_1, %c0_2] : memref<32x128xf32, #tpu.memory_space<vmem>>, vector<32x128xf32>
    %c0_3 = arith.constant 0 : index
    %c0_4 = arith.constant 0 : index
    %2 = vector.load %arg3[%c0_3, %c0_4] : memref<1x128xf32, #tpu.memory_space<vmem>>, vector<1x128xf32>
    %cst = arith.constant dense<0.000000e+00> : vector<128x128xf32>
    %3 = tpu.matmul %0, %1, %cst {dimension_numbers = #tpu.dot_dimension_numbers<[1], [0], [0], [1], [0, 0, 1, 1], [], []>} : vector<128x32xf32>, vector<32x128xf32>, vector<128x128xf32> -> vector<128x128xf32>
    %4 = vector.broadcast %2 : vector<1x128xf32> to vector<128x128xf32>
    %5 = arith.addf %3, %4 : vector<128x128xf32>
    %cst_5 = arith.constant 0.000000e+00 : f32
    %6 = vector.broadcast %cst_5 : f32 to vector<128x128xf32>
    %7 = arith.maximumf %5, %6 : vector<128x128xf32>
    %c0_6 = arith.constant 0 : index
    %c0_7 = arith.constant 0 : index
    %8 = vector.load %arg4[%c0_6, %c0_7] : memref<128x128xf32, #tpu.memory_space<vmem>>, vector<128x128xf32>
    %c0_8 = arith.constant 0 : index
    %c0_9 = arith.constant 0 : index
    %9 = vector.load %arg5[%c0_8, %c0_9] : memref<1x128xf32, #tpu.memory_space<vmem>>, vector<1x128xf32>
    %cst_10 = arith.constant dense<0.000000e+00> : vector<128x128xf32>
    %10 = tpu.matmul %7, %8, %cst_10 {dimension_numbers = #tpu.dot_dimension_numbers<[1], [0], [0], [1], [0, 0, 1, 1], [], []>} : vector<128x128xf32>, vector<128x128xf32>, vector<128x128xf32> -> vector<128x128xf32>
    %11 = vector.broadcast %9 : vector<1x128xf32> to vector<128x128xf32>
    %12 = arith.addf %10, %11 : vector<128x128xf32>
    %cst_11 = arith.constant 0.000000e+00 : f32
    %13 = vector.broadcast %cst_11 : f32 to vector<128x128xf32>
    %14 = arith.maximumf %12, %13 : vector<128x128xf32>
    %c0_12 = arith.constant 0 : index
    %c0_13 = arith.constant 0 : index
    %15 = vector.load %arg6[%c0_12, %c0_13] : memref<8x128xf32, #tpu.memory_space<vmem>>, vector<8x128xf32>
    %c0_14 = arith.constant 0 : index
    %c0_15 = arith.constant 0 : index
    %16 = vector.load %arg7[%c0_14, %c0_15] : memref<8x1xf32, #tpu.memory_space<vmem>>, vector<8x1xf32>
    %17 = tpu.transpose %14, [1, 0] : vector<128x128xf32> -> vector<128x128xf32>
    %cst_16 = arith.constant dense<0.000000e+00> : vector<8x128xf32>
    %18 = tpu.matmul %15, %17, %cst_16 {dimension_numbers = #tpu.dot_dimension_numbers<[1], [0], [0], [1], [0, 0, 1, 1], [], []>} : vector<8x128xf32>, vector<128x128xf32>, vector<8x128xf32> -> vector<8x128xf32>
    %19 = vector.broadcast %16 : vector<8x1xf32> to vector<8x128xf32>
    %20 = arith.addf %18, %19 : vector<8x128xf32>
    %21 = arith.negf %20 : vector<8x128xf32>
    %22 = math.exp %21 : vector<8x128xf32>
    %cst_17 = arith.constant 1.000000e+00 : f32
    %23 = vector.broadcast %cst_17 : f32 to vector<8x128xf32>
    %24 = arith.addf %23, %22 : vector<8x128xf32>
    %25 = arith.divf %23, %24 : vector<8x128xf32>
    %c0_18 = arith.constant 0 : index
    %c0_19 = arith.constant 0 : index
    %26 = vector.load %arg8[%c0_18, %c0_19] : memref<8x128xf32, #tpu.memory_space<vmem>>, vector<8x128xf32>
    tpu.vector_store %arg8[%c0_18, %c0_19], %25 {strides = array<i32>} : memref<8x128xf32, #tpu.memory_space<vmem>>, vector<8x128xf32>,
    return
  }
  func.func @transform_0(%arg0: i32) -> (i32, i32) {
    %c0_i32 = arith.constant 0 : i32
    %c0_i32_0 = arith.constant 0 : i32
    return %arg0, %c0_i32 : i32, i32
  }
  func.func @transform_1(%arg0: i32) -> (i32, i32) {
    %c0_i32 = arith.constant 0 : i32
    %c0_i32_0 = arith.constant 0 : i32
    %c0_i32_1 = arith.constant 0 : i32
    return %c0_i32, %c0_i32_0 : i32, i32
  }
  func.func @transform_2(%arg0: i32) -> (i32, i32) {
    %c0_i32 = arith.constant 0 : i32
    %c0_i32_0 = arith.constant 0 : i32
    %c0_i32_1 = arith.constant 0 : i32
    return %c0_i32, %c0_i32_0 : i32, i32
  }
  func.func @transform_3(%arg0: i32) -> (i32, i32) {
    %c0_i32 = arith.constant 0 : i32
    %c0_i32_0 = arith.constant 0 : i32
    %c0_i32_1 = arith.constant 0 : i32
    return %c0_i32, %c0_i32_0 : i32, i32
  }
  func.func @transform_4(%arg0: i32) -> (i32, i32) {
    %c0_i32 = arith.constant 0 : i32
    %c0_i32_0 = arith.constant 0 : i32
    %c0_i32_1 = arith.constant 0 : i32
    return %c0_i32, %c0_i32_0 : i32, i32
  }
  func.func @transform_5(%arg0: i32) -> (i32, i32) {
    %c0_i32 = arith.constant 0 : i32
    %c0_i32_0 = arith.constant 0 : i32
    %c0_i32_1 = arith.constant 0 : i32
    return %c0_i32, %c0_i32_0 : i32, i32
  }
  func.func @transform_6(%arg0: i32) -> (i32, i32) {
    %c0_i32 = arith.constant 0 : i32
    %c0_i32_0 = arith.constant 0 : i32
    %c0_i32_1 = arith.constant 0 : i32
    return %c0_i32, %c0_i32_0 : i32, i32
  }
  func.func @transform_7(%arg0: i32) -> (i32, i32) {
    %c0_i32 = arith.constant 0 : i32
    %c0_i32_0 = arith.constant 0 : i32
    return %c0_i32, %arg0 : i32, i32
  }
}

</mosaic_0001>

<bundles_post_ra>
// kernel: tpu_custom_call.1
= control target key start
LH: loop header
LB: loop body
LE: loop exit
PB: predicated region body
PF: predicated region fallthrough
CT: control target
= control target key end

     0   :  { %vm54_vm0 = vcmask 261120   ;;  %s1056_s0 = inlined_call_operand.vmem [shape: f32[128,32], index: 0, kind: input, shape index: {}]   ;;  %s1057_s1 = inlined_call_operand.vmem [shape: f32[32,128], index: 1, kind: input, shape index: {}]   ;;  %s1058_s2 = inlined_call_operand.vmem [shape: f32[1,128], index: 2, kind: input, shape index: {}]   ;;  %s1059_s3 = inlined_call_operand.vmem [shape: f32[128,128], index: 3, kind: input, shape index: {}]   ;;  %s1060_s4 = inlined_call_operand.vmem [shape: f32[1,128], index: 4, kind: input, shape index: {}]   ;;  %s1061_s5 = inlined_call_operand.vmem [shape: f32[8,128], index: 5, kind: input, shape index: {}]   ;;  %s1062_s6 = inlined_call_operand.vmem [shape: f32[8,1], index: 6, kind: input, shape index: {}]   ;;  %s1063_s7 = inlined_call_operand.hbm [shape: f32[8,128], index: 7, kind: output, shape index: {}]  }
   0x1   :  { %v43_v0 = vld [vmem:[%s1057_s1] sm:$0xff]  ;;  %v44_v1 = vld [vmem:[%s1057_s1 + $0x8] sm:$0xff]  ;;  %v45_v2 = vld [vmem:[%s1057_s1 + $0x10] sm:$0xff] }
   0x2   :  { %v757_v3 = vpack.c.bf16 %v44_v1, %v43_v0  ;;  %v46_v4 = vld [vmem:[%s1057_s1 + $0x18] sm:$0xff]  ;;  %v27_v5 = vld [vmem:[%s1056_s0] sm:$0xff]  ;;  %v265_v8 = vld [vmem:[%s1059_s3 + $0x8] sm:$0xff] }
   0x3   :  { %v761_v6 = vpack.c.bf16 %v46_v4, %v45_v2  ;;  %642 = vmatprep.mubr.msk.f32.mxu1 %vm54_vm0, %v27_v5  ;;  %v264_v7 = vld [vmem:[%s1059_s3] sm:$0xff]  ;;  %v266_v9 = vld [vmem:[%s1059_s3 + $0x10] sm:$0xff]  ;;  %v267_v10 = vld [vmem:[%s1059_s3 + $0x18] sm:$0xff] }
   0x4   :  { %758 = vmatprep.subr.bf16.mxu1 %v757_v3  ;;  %v28_v11 = vld [vmem:[%s1056_s0 + $0x8] sm:$0xff]  ;;  %v765_v12 = vpack.c.bf16 %v265_v8, %v264_v7  ;;  %v29_v13 = vld [vmem:[%s1056_s0 + $0x10] sm:$0xff]  ;;  %v769_v14 = vpack.c.bf16 %v267_v10, %v266_v9  ;;  %v268_v15 = vld [vmem:[%s1059_s3 + $0x20] sm:$0xff] }
   0x5   :  { %760 = vmatpush3.bf16.msra.mxu1 %v757_v3  ;;  %v269_v16 = vld [vmem:[%s1059_s3 + $0x28] sm:$0xff] }
   0x6   :  { %762 = vmatprep.subr.bf16.mxu1 %v761_v6 }
   0x9   :  { %764 = vmatpush3.bf16.msra.mxu1 %v761_v6 }
   0xa   :  { %766 = vmatprep.subr.bf16.mxu1 %v765_v12 }
   0xc   :  { %643 = vmatmul.mubr.msk.f32.vlgmr.msra.gmra.mrb[0].mxu1 %vm54_vm0, %v28_v11 }
   0xd   :  { %12 = vsyncpa [#allocation3], 0  ;;  %645 = vmatprep.mubr.msk.f32.mxu1 %vm54_vm0, %v29_v13  ;;  %v30_v17 = vld [vmem:[%s1056_s0 + $0x18] sm:$0xff]  ;;  %768 = vmatpush3.bf16.msra.mxu1 %v765_v12  ;;  %v31_v18 = vld [vmem:[%s1056_s0 + $0x20] sm:$0xff]  ;;  %v773_v19 = vpack.c.bf16 %v269_v16, %v268_v15  ;;  %vm856_vm1 = vmmov 0   ;;  %s859_s27 = smov [#allocation2]  }
   0xe   :  { %770 = vmatprep.subr.bf16.mxu1 %v769_v14  ;;  %v270_v20 = vld [vmem:[%s1059_s3 + $0x30] sm:$0xff]  ;;  %v271_v21 = vld [vmem:[%s1059_s3 + $0x38] sm:$0xff]  ;;  %v32_v22 = vld [vmem:[%s1056_s0 + $0x28] sm:$0xff]  ;;  %s538_s28 = sshll.u32 %s859_s27, 4  ;;  %s539_s28 = int_to_ptr.vmem [resolvable:$true] %s538_s28 }
   0xf   :  { %v33_v23 = vld [vmem:[%s1056_s0 + $0x30] sm:$0xff]  ;;  %v777_v24 = vpack.c.bf16 %v271_v21, %v270_v20  ;;  %v272_v25 = vld [vmem:[%s1059_s3 + $0x40] sm:$0xff]  ;;  %v273_v26 = vld [vmem:[%s1059_s3 + $0x48] sm:$0xff]  ;;  %s831_s29 = scalar_lea.vmem %s539_s28, 128  ;;  %p836_p1 = scmp.lt.s32.totalorder %s539_s28, %s539_s28 }
  0x10   :  { %646 = vmatmul.mubr.msk.f32.gmra.mrb[2].mxu1 %vm54_vm0, %v30_v17  ;;  %v34_v27 = vld [vmem:[%s1056_s0 + $0x38] sm:$0xff]  ;;  %v35_v28 = vld [vmem:[%s1056_s0 + $0x40] sm:$0xff]  ;;  %v781_v29 = vpack.c.bf16 %v273_v26, %v272_v25  ;;  %v274_v30 = vld [vmem:[%s1059_s3 + $0x50] sm:$0xff]  ;;  %p832_p0 = scmp.ne.s32.totalorder %s539_s28, %s831_s29  ;;  %p837_p2 = scmp.lt.s32.totalorder %s831_s29, %s831_s29 }
  0x11   :  { %648 = vmatprep.mubr.msk.f32.mxu1 %vm54_vm0, %v31_v18  ;;  %772 = vmatpush3.bf16.msra.mxu1 %v769_v14  ;;  %v275_v31 = vld [vmem:[%s1059_s3 + $0x58] sm:$0xff]  ;;  %v36_v32 = vld [vmem:[%s1056_s0 + $0x48] sm:$0xff]  ;;  %v37_v33 = vld [vmem:[%s1056_s0 + $0x50] sm:$0xff] }
  0x12   :  { %774 = vmatprep.subr.bf16.mxu1 %v773_v19  ;;  %v785_v34 = vpack.c.bf16 %v275_v31, %v274_v30  ;;  %v276_v35 = vld [vmem:[%s1059_s3 + $0x60] sm:$0xff]  ;;  %v277_v36 = vld [vmem:[%s1059_s3 + $0x68] sm:$0xff]  ;;  %v38_v37 = vld [vmem:[%s1056_s0 + $0x58] sm:$0xff]  ;;  %v855_v31 = vmov 0.0|0.0   ;;  %p838_p3 = por %p837_p2, %p836_p1 }
  0x13   :  { %v39_v38 = vld [vmem:[%s1056_s0 + $0x60] sm:$0xff]  ;;  %v789_v39 = vpack.c.bf16 %v277_v36, %v276_v35  ;;  %v40_v40 = vld [vmem:[%s1056_s0 + $0x68] sm:$0xff]  ;;  %v41_v41 = vld [vmem:[%s1056_s0 + $0x70] sm:$0xff]  ;;  %797 = vmatprep.subr.bf16.mxu0 %v855_v31 }
  0x14   :  { %649 = vmatmul.mubr.msk.f32.gmra.mrb[4].mxu1 %vm54_vm0, %v32_v22  ;;  %v42_v42 = vld [vmem:[%s1056_s0 + $0x78] sm:$0xff]  ;;  %v278_v43 = vld [vmem:[%s1059_s3 + $0x70] sm:$0xff]  ;;  %v546_v46 = vld [vmem:[%s1058_s2] ss:$0 sm:$0xff]  ;;  %p839_p4 = pnand %p838_p3, %p832_p0 }
  0x15   :  { %651 = vmatprep.mubr.msk.f32.mxu1 %vm54_vm0, %v33_v23  ;;  %776 = vmatpush3.bf16.msra.mxu1 %v773_v19  ;;  %v279_v44 = vld [vmem:[%s1059_s3 + $0x78] sm:$0xff]  ;;  %v563_v35 = vld [vmem:[%s1060_s4] ss:$0 sm:$0xff] }
  0x16   :  { %778 = vmatprep.subr.bf16.mxu1 %v777_v24  ;;  %v793_v45 = vpack.c.bf16 %v279_v44, %v278_v43 }
  0x18   :  { %652 = vmatmul.mubr.msk.f32.gmra.mrb[6].mxu1 %vm54_vm0, %v34_v27 }
  0x19   :  { %654 = vmatprep.mubr.msk.f32.mxu1 %vm54_vm0, %v35_v28  ;;  %780 = vmatpush3.bf16.msra.mxu1 %v777_v24 }
  0x1a   :  { %782 = vmatprep.subr.bf16.mxu1 %v781_v29 }
  0x1c   :  { %655 = vmatmul.mubr.msk.f32.gmra.mrb[8].mxu1 %vm54_vm0, %v36_v32  ;;  %v857_v32 = vmov 0.0  }
  0x1d   :  { %657 = vmatprep.mubr.msk.f32.mxu1 %vm54_vm0, %v37_v33  ;;  %784 = vmatpush3.bf16.msra.mxu1 %v781_v29  ;;  %v449_v33 = vld [vmem:[%s1062_s6] sm:$0xff] }
  0x1e   :  { %786 = vmatprep.subr.bf16.mxu1 %v785_v34  ;;  %754 = vmatprep.mubr.msk.f32.mxu0 %vm856_vm1, %v857_v32 }
  0x20   :  { %658 = vmatmul.mubr.msk.f32.gmra.mrb[10].mxu1 %vm54_vm0, %v38_v37 }
  0x21   :  { %660 = vmatprep.mubr.msk.f32.mxu1 %vm54_vm0, %v39_v38  ;;  %788 = vmatpush3.bf16.msra.mxu1 %v785_v34  ;;  %v858_v34 = vmov 0  }
  0x22   :  { %790 = vmatprep.subr.bf16.mxu1 %v789_v39  ;;  %826 = vset.pattern.permute.xlu0 %v858_v34 }
  0x23   :  { %452 = vperm.xlu0 %826, %v449_v33  }
  0x24   :  { %661 = vmatmul.mubr.msk.f32.gmra.mrb[12].mxu1 %vm54_vm0, %v40_v40 }
  0x25   :  { %663 = vmatprep.mubr.msk.f32.mxu1 %vm54_vm0, %v41_v41  ;;  %792 = vmatpush3.bf16.msra.mxu1 %v789_v39 }
  0x26   :  { %794 = vmatprep.subr.bf16.mxu1 %v793_v45 }
  0x28   :  { %664 = vmatmul.mubr.msk.f32.gmra.mrb[14].mxu1 %vm54_vm0, %v42_v42 }
  0x29   :  { %796 = vmatpush3.bf16.msra.mxu1 %v793_v45 }
  0xdf   :  { %v644_v47 = vpop.f32.mrb[0].mxu1 }
  0xe0   :  { %v175_v48 = vadd.f32 %v644_v47, %v546_v46  ;;  %v169_v49 = vpop.f32.mrb[1].mxu1 }
  0xe1   :  { %v170_v50 = vadd.f32 %v546_v46, %v169_v49 }
  0xe2   :  { %v249_v53 = vmax.f32 %v175_v48, 0.0 }
  0xe3   :  { %v248_v51 = vmax.f32 %v170_v50, 0.0  ;;  %v647_v52 = vpop.f32.mrb[2].mxu1 }
  0xe4   :  { %v185_v54 = vadd.f32 %v647_v52, %v546_v46  ;;  %v179_v55 = vpop.f32.mrb[3].mxu1 }
  0xe5   :  { %v180_v56 = vadd.f32 %v546_v46, %v179_v55  ;;  %698 = vmatprep.mubr.f32.mxu1 %v248_v51 }
  0xe6   :  { %v251_v57 = vmax.f32 %v185_v54, 0.0  ;;  %699 = vmatmul.mubr.f32.vlgmr.msra.gmra.mrb[16].mxu1 %v249_v53 }
  0xe7   :  { %v250_v58 = vmax.f32 %v180_v56, 0.0  ;;  %v650_v59 = vpop.f32.mrb[4].mxu1 }
  0xe8   :  { %v195_v60 = vadd.f32 %v650_v59, %v546_v46  ;;  %v189_v61 = vpop.f32.mrb[5].mxu1 }
  0xe9   :  { %701 = vmatprep.mubr.f32.mxu1 %v250_v58  ;;  %v190_v62 = vadd.f32 %v546_v46, %v189_v61 }
  0xea   :  { %702 = vmatmul.mubr.f32.gmra.mrb[18].mxu1 %v251_v57  ;;  %v253_v63 = vmax.f32 %v195_v60, 0.0 }
  0xeb   :  { %v252_v0 = vmax.f32 %v190_v62, 0.0  ;;  %v653_v1 = vpop.f32.mrb[6].mxu1 }
  0xec   :  { %v205_v2 = vadd.f32 %v653_v1, %v546_v46  ;;  %v199_v3 = vpop.f32.mrb[7].mxu1 }
  0xed   :  { %704 = vmatprep.mubr.f32.mxu1 %v252_v0  ;;  %v200_v4 = vadd.f32 %v546_v46, %v199_v3 }
  0xee   :  { %705 = vmatmul.mubr.f32.gmra.mrb[20].mxu1 %v253_v63  ;;  %v255_v5 = vmax.f32 %v205_v2, 0.0 }
  0xef   :  { %v254_v6 = vmax.f32 %v200_v4, 0.0  ;;  %v656_v7 = vpop.f32.mrb[8].mxu1 }
  0xf0   :  { %v215_v8 = vadd.f32 %v656_v7, %v546_v46  ;;  %v209_v9 = vpop.f32.mrb[9].mxu1 }
  0xf1   :  { %707 = vmatprep.mubr.f32.mxu1 %v254_v6  ;;  %v210_v10 = vadd.f32 %v546_v46, %v209_v9 }
  0xf2   :  { %708 = vmatmul.mubr.f32.gmra.mrb[22].mxu1 %v255_v5  ;;  %v257_v11 = vmax.f32 %v215_v8, 0.0 }
  0xf3   :  { %v256_v12 = vmax.f32 %v210_v10, 0.0  ;;  %v659_v13 = vpop.f32.mrb[10].mxu1 }
  0xf4   :  { %v225_v14 = vadd.f32 %v659_v13, %v546_v46  ;;  %v219_v15 = vpop.f32.mrb[11].mxu1 }
  0xf5   :  { %710 = vmatprep.mubr.f32.mxu1 %v256_v12  ;;  %v220_v16 = vadd.f32 %v546_v46, %v219_v15 }
  0xf6   :  { %711 = vmatmul.mubr.f32.gmra.mrb[24].mxu1 %v257_v11  ;;  %v259_v17 = vmax.f32 %v225_v14, 0.0 }
  0xf7   :  { %v258_v18 = vmax.f32 %v220_v16, 0.0  ;;  %v662_v19 = vpop.f32.mrb[12].mxu1 }
  0xf8   :  { %v235_v20 = vadd.f32 %v662_v19, %v546_v46  ;;  %v229_v21 = vpop.f32.mrb[13].mxu1 }
  0xf9   :  { %713 = vmatprep.mubr.f32.mxu1 %v258_v18  ;;  %v230_v22 = vadd.f32 %v546_v46, %v229_v21 }
  0xfa   :  { %714 = vmatmul.mubr.f32.gmra.mrb[26].mxu1 %v259_v17  ;;  %v261_v23 = vmax.f32 %v235_v20, 0.0 }
  0xfb   :  { %v260_v24 = vmax.f32 %v230_v22, 0.0  ;;  %v665_v25 = vpop.f32.mrb[14].mxu1 }
  0xfc   :  { %v245_v26 = vadd.f32 %v665_v25, %v546_v46  ;;  %v239_v27 = vpop.f32.mrb[15].mxu1 }
  0xfd   :  { %716 = vmatprep.mubr.f32.mxu1 %v260_v24  ;;  %v240_v28 = vadd.f32 %v546_v46, %v239_v27 }
  0xfe   :  { %717 = vmatmul.mubr.f32.gmra.mrb[28].mxu1 %v261_v23  ;;  %v263_v29 = vmax.f32 %v245_v26, 0.0 }
  0xff   :  { %v262_v30 = vmax.f32 %v240_v28, 0.0  ;;  %v448_v28 = vld [vmem:[%s1061_s5] sm:$0xff] }
 0x101   :  { %719 = vmatprep.mubr.f32.mxu1 %v262_v30 }
 0x102   :  { %720 = vmatmul.mubr.f32.gmra.mrb[30].mxu1 %v263_v29  ;;  %v453_v29 = vpop.permute.xlu0 %452 }
 0x1b9   :  { %v700_v36 = vpop.f32.mrb[16].mxu1 }
 0x1ba   :  { %v359_v37 = vadd.f32 %v700_v36, %v563_v35  ;;  %v353_v38 = vpop.f32.mrb[17].mxu1 }
 0x1bb   :  { %v354_v39 = vadd.f32 %v563_v35, %v353_v38 }
 0x1bc   :  { %v433_v40 = vmax.f32 %v359_v37, 0.0 }
 0x1bd   :  { %v432_v41 = vmax.f32 %v354_v39, 0.0  ;;  %v703_v42 = vpop.f32.mrb[18].mxu1 }
 0x1be   :  { %v369_v43 = vadd.f32 %v703_v42, %v563_v35  ;;  %v363_v44 = vpop.f32.mrb[19].mxu1 }
 0x1bf   :  { %v364_v45 = vadd.f32 %v563_v35, %v363_v44  ;;  %v798_v46 = vpack.c.bf16 %v433_v40, %v432_v41 }
 0x1c0   :  { %v435_v47 = vmax.f32 %v369_v43, 0.0 }
 0x1c1   :  { %v434_v48 = vmax.f32 %v364_v45, 0.0  ;;  %799 = vmatpush3.bf16.xpose.msra.mxu0 %v798_v46  ;;  %v706_v49 = vpop.f32.mrb[20].mxu1 }
 0x1c2   :  { %v379_v50 = vadd.f32 %v706_v49, %v563_v35  ;;  %v373_v51 = vpop.f32.mrb[21].mxu1  ;;  %800 = vmatprep.subr.bf16.mxu0 %v855_v31 }
 0x1c3   :  { %v801_v52 = vpack.c.bf16 %v435_v47, %v434_v48  ;;  %v374_v53 = vadd.f32 %v563_v35, %v373_v51 }
 0x1c4   :  { %v437_v54 = vmax.f32 %v379_v50, 0.0 }
 0x1c5   :  { %v436_v55 = vmax.f32 %v374_v53, 0.0  ;;  %v709_v56 = vpop.f32.mrb[22].mxu1 }
 0x1c6   :  { %v389_v57 = vadd.f32 %v709_v56, %v563_v35  ;;  %v383_v58 = vpop.f32.mrb[23].mxu1 }
 0x1c7   :  { %v804_v59 = vpack.c.bf16 %v437_v54, %v436_v55  ;;  %v384_v60 = vadd.f32 %v563_v35, %v383_v58 }
 0x1c8   :  { %v439_v61 = vmax.f32 %v389_v57, 0.0 }
 0x1c9   :  { %802 = vmatpush3.bf16.xpose.msra.mxu0 %v801_v52  ;;  %v438_v62 = vmax.f32 %v384_v60, 0.0  ;;  %v712_v63 = vpop.f32.mrb[24].mxu1 }
 0x1ca   :  { %803 = vmatprep.subr.bf16.mxu0 %v855_v31  ;;  %v399_v0 = vadd.f32 %v712_v63, %v563_v35  ;;  %v393_v1 = vpop.f32.mrb[25].mxu1 }
 0x1cb   :  { %v807_v2 = vpack.c.bf16 %v439_v61, %v438_v62  ;;  %v394_v3 = vadd.f32 %v563_v35, %v393_v1 }
 0x1cc   :  { %v441_v4 = vmax.f32 %v399_v0, 0.0 }
 0x1cd   :  { %v440_v5 = vmax.f32 %v394_v3, 0.0  ;;  %v715_v6 = vpop.f32.mrb[26].mxu1 }
 0x1ce   :  { %v409_v7 = vadd.f32 %v715_v6, %v563_v35  ;;  %v403_v8 = vpop.f32.mrb[27].mxu1 }
 0x1cf   :  { %v810_v9 = vpack.c.bf16 %v441_v4, %v440_v5  ;;  %v404_v10 = vadd.f32 %v563_v35, %v403_v8 }
 0x1d0   :  { %v443_v11 = vmax.f32 %v409_v7, 0.0 }
 0x1d1   :  { %805 = vmatpush3.bf16.xpose.msra.mxu0 %v804_v59  ;;  %v442_v12 = vmax.f32 %v404_v10, 0.0  ;;  %v718_v13 = vpop.f32.mrb[28].mxu1 }
 0x1d2   :  { %806 = vmatprep.subr.bf16.mxu0 %v855_v31  ;;  %v419_v14 = vadd.f32 %v718_v13, %v563_v35  ;;  %v413_v15 = vpop.f32.mrb[29].mxu1 }
 0x1d3   :  { %v813_v16 = vpack.c.bf16 %v443_v11, %v442_v12  ;;  %v414_v17 = vadd.f32 %v563_v35, %v413_v15 }
 0x1d4   :  { %v445_v18 = vmax.f32 %v419_v14, 0.0 }
 0x1d5   :  { %v444_v19 = vmax.f32 %v414_v17, 0.0  ;;  %v721_v20 = vpop.f32.mrb[30].mxu1 }
 0x1d6   :  { %v429_v21 = vadd.f32 %v721_v20, %v563_v35  ;;  %v423_v22 = vpop.f32.mrb[31].mxu1 }
 0x1d7   :  { %v816_v23 = vpack.c.bf16 %v445_v18, %v444_v19  ;;  %v424_v24 = vadd.f32 %v563_v35, %v423_v22 }
 0x1d8   :  { %v447_v25 = vmax.f32 %v429_v21, 0.0 }
 0x1d9   :  { %808 = vmatpush3.bf16.xpose.msra.mxu0 %v807_v2  ;;  %v446_v26 = vmax.f32 %v424_v24, 0.0 }
 0x1da   :  { %809 = vmatprep.subr.bf16.mxu0 %v855_v31 }
 0x1db   :  { %v819_v27 = vpack.c.bf16 %v447_v25, %v446_v26 }
 0x1e1   :  { %811 = vmatpush3.bf16.xpose.msra.mxu0 %v810_v9 }
 0x1e2   :  { %812 = vmatprep.subr.bf16.mxu0 %v855_v31 }
 0x1e9   :  { %814 = vmatpush3.bf16.xpose.msra.mxu0 %v813_v16 }
 0x1ea   :  { %815 = vmatprep.subr.bf16.mxu0 %v855_v31 }
 0x1f1   :  { %817 = vmatpush3.bf16.xpose.msra.mxu0 %v816_v23 }
 0x1f2   :  { %818 = vmatprep.subr.bf16.mxu0 %v855_v31 }
 0x1f9   :  { %820 = vmatpush3.bf16.xpose.msra.mxu0 %v819_v27 }
 0x200   :  { %755 = vmatmul.mubr.f32.vlgmr.msra.gmra.mrb[0].mxu0 %v448_v28 }
 0x2d3   :  { %v521_v30 = vpop.f32.mrb[0].mxu0 }
 0x2d4   :  { %v522_v32 = vadd.f32 %v521_v30, %v453_v29  ;;  %v756_v33 = vpop.f32.mrb[1].mxu0 }
 0x2d6   :  { %v564_v34 = vmul.f32 -1.442695, %v522_v32 }
 0x2d8   :  { %827 = vpow2.f32 %v564_v34 }
 0x2e2   :  { %v828_v35 = vpop.eup %827 }
 0x2e3   :  { %v528_v36 = vadd.f32 1.0, %v828_v35 }
 0x2e5   :  { %829 = vrcp.f32 %v528_v36 }
 0x2ef   :  { %v830_v37 = vpop.eup %829 }
 0x2f0   :  { %531 = vst [vmem:[#allocation2] sm:$0xff] %v830_v37 }
 0x2f1   :  { %842 = shalt.err (!%p839_p4)
}
 0x2f2   :  { %s843_s8 = scalar_lea.hbm %s1063_s7, 128 }
 0x2f3   :  { %p844_p5 = scmp.ne.s32.totalorder %s1063_s7, %s843_s8  ;;  %p847_p6 = scmp.lt.u32.totalorder %s843_s8, %s1063_s7 }
 0x2f5   :  { %p849_p7 = pnand %p847_p6, %p844_p5 }
 0x2f7   :  { %852 = shalt.err (!%p849_p7)
}
 0x2f8   :  { %541 = dma.vmem_to_hbm [thread:$0]  %s539_s28, 128, %s1063_s7, [#allocation3]  }
 0x2f9   :  { %853 = dma.done.wait [#allocation3], 128  }
 0x2fa   :  { %854 = vsyncadd [#allocation3], 4294967168 }
 0x2fb   :  { %545 = vsyncpa [#allocation3], 1 }

</bundles_post_ra>
